<compile_context>
chip_gen: v6e
topology: v6e:2x2x1
jax: 0.10.0
libtpu: 0.0.40
codegen_flags: <defaults>
</compile_context>

<pallas_src>
import functools

import jax
import jax.numpy as jnp
from jax import lax
from jax.experimental import pallas as pl
from jax.experimental.pallas import tpu as pltpu


# ----------------------------- kernels ---------------------------------------


def _norm_kernel(x_ref, f_ref, ifw_ref, b_ref, y_ref, mean2_ref, std_ref, *,
                 eps, affine):
    # x_ref block: (Bb, T, C); f_ref: (C, 2C); ifw_ref: (2C, C); b_ref: (1, C)
    Bb, T, C = x_ref.shape
    x = x_ref[...].astype(jnp.float32).reshape(Bb * T, C)

    # fused forward DFT along the feature axis: columns [0:C]=Re, [C:2C]=Im
    xf = jnp.dot(x, f_ref[...], preferred_element_type=jnp.float32)     # (Bb*T, 2C)
    xf = xf.reshape(Bb, T, 2 * C)

    # complex mean over time (keepdim), stored fused as [Re(mean) | Im(mean)]
    mean2 = jnp.mean(xf, axis=1, keepdims=True)                         # (Bb, 1, 2C)
    d = xf - mean2

    # population complex variance: E[|z - mean|^2] = E[dre^2] + E[dim^2]
    s2 = jnp.mean(d * d, axis=1, keepdims=True)                         # (Bb, 1, 2C)
    var = s2[..., :C] + s2[..., C:]                                     # (Bb, 1, C)
    ve = var + eps
    inv = lax.rsqrt(ve)                                                 # tiny, EUP
    std = ve * inv                                                      # = sqrt(var+eps)
    inv2 = jnp.concatenate([inv, inv], axis=-1)                         # (Bb, 1, 2C)

    n = (d * inv2).reshape(Bb * T, 2 * C)

    # fused inverse DFT (real part); the affine weight is pre-folded into ifw_ref
    y = jnp.dot(n, ifw_ref[...], preferred_element_type=jnp.float32)
    y = y.reshape(Bb, T, C)
    if affine:
        y = y + b_ref[...]

    y_ref[...] = y.astype(y_ref.dtype)
    mean2_ref[...] = mean2
    std_ref[...] = std


def _denorm_kernel(x_ref, f_ref, if_ref, bf_ref, mean2_ref, std_ref, y_ref, *,
                   affine):
    # x_ref block: (Bb, T, C)
    # f_ref: (C, 2C) with 1/(w+eps^2) pre-folded into its rows
    # bf_ref: (1, 2C) = bias @ f_ref (precomputed in the wrapper)
    Bb, T, C = x_ref.shape
    x = x_ref[...].astype(jnp.float32).reshape(Bb * T, C)

    xf = jnp.dot(x, f_ref[...], preferred_element_type=jnp.float32)     # (Bb*T, 2C)
    xf = xf.reshape(Bb, T, 2 * C)

    std = std_ref[...]                                                  # (Bb, 1, C)
    std2 = jnp.concatenate([std, std], axis=-1)                         # (Bb, 1, 2C)
    off = mean2_ref[...]                                                # (Bb, 1, 2C)
    if affine:
        # fft((x - b) * inv_w) * std + mean  ==  (x @ f) * std + (mean - bF * std)
        off = off - bf_ref[...] * std2
    xf = xf * std2 + off

    y = jnp.dot(xf.reshape(Bb * T, 2 * C), if_ref[...],
                preferred_element_type=jnp.float32)
    y_ref[...] = y.reshape(Bb, T, C).astype(y_ref.dtype)


# ----------------------------- wrapper ----------------------------------------


def _round_up(a, m):
    return ((a + m - 1) // m) * m


class RevINFreqPallas:
    """Pallas TPU implementation of RevIN_freq (norm / denorm modes)."""

    def __init__(self, num_features: int, eps: float = 1e-5, affine: bool = True):
        self.C = num_features
        self.eps = float(eps)
        self.affine = affine

        if affine:
            self.affine_weight = jnp.ones((num_features,), jnp.float32)
            self.affine_bias = jnp.zeros((num_features,), jnp.float32)

        # DFT / inverse-DFT matrices, fused real+imag
        n = jnp.arange(num_features, dtype=jnp.float32)
        ang = 2.0 * jnp.pi * n[:, None] * n[None, :] / num_features
        Fr = jnp.cos(ang)                      # Re(exp(-i ang))
        Fi = -jnp.sin(ang)                     # Im(exp(-i ang))
        IFr = jnp.cos(ang) / num_features      # Re(exp(+i ang)) / C
        IFi = jnp.sin(ang) / num_features      # Im(exp(+i ang)) / C
        self.F = jnp.concatenate([Fr, Fi], axis=1)       # (C, 2C): x @ F = [Re|Im]
        self.IF = jnp.concatenate([IFr, -IFi], axis=0)   # (2C, C): [re|im] @ IF = Re(ifft)

        # statistics state, filled by mode='norm'
        self.mean2 = None      # (B, 1, 2C) = [Re(mean) | Im(mean)]
        self.mean = None       # complex, for parity with the PyTorch module
        self.stdev = None      # (B, 1, C)
        # NOTE: self.x_freq (complex FFT of the input) is an internal intermediate in
        # the PyTorch module; it is never materialized to HBM here.

    # ---- forward ----
    def __call__(self, x, mode: str):
        if mode == "norm":
            return self._normalize(x)
        elif mode == "denorm":
            return self._denormalize(x)
        raise NotImplementedError

    # ---- block sizing ----
    @staticmethod
    def _choose_block_b(B, T, C, in_itemsize, out_itemsize,
                        budget_bytes=8 << 20):
        # VMEM footprint per batch row inside one block, accounting for the (8,128)
        # lane/sublane padding the Mosaic layout imposes on the small-C blocks, the
        # double-buffered input/output pipelines and the f32 compute temporaries
        # (xf, d, p, n), so the total stays well inside the 16 MiB (v5e) / 32 MiB
        # (v6e, v7x) default scoped-VMEM limit.
        cp = _round_up(C, 128)
        c2p = _round_up(2 * C, 128)
        tp = _round_up(T, 8)
        per_row = tp * cp * 2 * (in_itemsize + out_itemsize)   # x/y blocks, 2-deep
        per_row += tp * c2p * 4 * 4                            # ~4 live f32 temps
        per_row += 8 * (c2p + cp) * 4 * 2                      # stats out blocks
        bb = max(1, min(B, budget_bytes // max(per_row, 1)))
        # keep >= 2 grid steps so the two v7x TensorCores both get work
        if B >= 2:
            bb = min(bb, max(1, B // 2))
        # round down to a divisor of B (no partial blocks)
        while B % bb:
            bb -= 1
        return bb

    @staticmethod
    def _specs(bb, T, C):
        x_spec = pl.BlockSpec((bb, T, C), lambda i: (i, 0, 0))
        f_spec = pl.BlockSpec((C, 2 * C), lambda i: (0, 0))
        if_spec = pl.BlockSpec((2 * C, C), lambda i: (0, 0))
        m_spec = pl.BlockSpec((bb, 1, 2 * C), lambda i: (i, 0, 0))
        s_spec = pl.BlockSpec((bb, 1, C), lambda i: (i, 0, 0))
        return x_spec, f_spec, if_spec, m_spec, s_spec

    def _normalize(self, x):
        B, T, C = x.shape
        assert C == self.C
        bb = self._choose_block_b(B, T, C, x.dtype.itemsize, x.dtype.itemsize)
        x_spec, f_spec, if_spec, m_spec, s_spec = self._specs(bb, T, C)
        b_spec = pl.BlockSpec((1, C), lambda i: (0, 0))

        if self.affine:
            ifw = self.IF * self.affine_weight[None, :]   # fold affine weight (2C, C)
            b2 = self.affine_bias.reshape(1, C)
        else:
            ifw = self.IF
            b2 = jnp.zeros((1, C), jnp.float32)

        y, mean2, std = pl.pallas_call(
            functools.partial(_norm_kernel, eps=self.eps, affine=self.affine),
            out_shape=(
                jax.ShapeDtypeStruct((B, T, C), x.dtype),
                jax.ShapeDtypeStruct((B, 1, 2 * C), jnp.float32),
                jax.ShapeDtypeStruct((B, 1, C), jnp.float32),
            ),
            grid=(B // bb,),
            in_specs=[x_spec, f_spec, if_spec, b_spec],
            out_specs=(x_spec, m_spec, s_spec),
            compiler_params=pltpu.CompilerParams(
                dimension_semantics=("parallel",)),
        )(x, self.F, ifw, b2)

        self.mean2 = mean2
        self.stdev = std
        self.mean = mean2[..., :C] + 1j * mean2[..., C:]
        return y

    def _denormalize(self, x):
        assert self.mean2 is not None, "call mode='norm' first"
        B, T, C = x.shape
        assert C == self.C and self.stdev.shape[0] == B
        bb = self._choose_block_b(B, T, C, x.dtype.itemsize, x.dtype.itemsize)
        x_spec, f_spec, if_spec, m_spec, s_spec = self._specs(bb, T, C)
        bf_spec = pl.BlockSpec((1, 2 * C), lambda i: (0, 0))

        if self.affine:
            inv_w = 1.0 / (self.affine_weight + self.eps * self.eps)
            f = self.F * inv_w[:, None]                   # fold 1/(w+eps^2) into DFT rows
            bF = jnp.dot(self.affine_bias.reshape(1, C), f)   # (1, 2C), folded bias
        else:
            f = self.F
            bF = jnp.zeros((1, 2 * C), jnp.float32)

        y = pl.pallas_call(
            functools.partial(_denorm_kernel, affine=self.affine),
            out_shape=jax.ShapeDtypeStruct((B, T, C), x.dtype),
            grid=(B // bb,),
            in_specs=[x_spec, f_spec, if_spec, bf_spec, m_spec, s_spec],
            out_specs=x_spec,
            compiler_params=pltpu.CompilerParams(
                dimension_semantics=("parallel",)),
        )(x, f, self.IF, bF, self.mean2, self.stdev)
        return y


# ----------------------------- reference (pure JAX) ---------------------------


def _ref_norm(x, w, b, eps):
    xf = jnp.fft.fft(x, axis=-1)
    mean = jnp.mean(xf, axis=1, keepdims=True)
    var = jnp.var(xf, axis=1, keepdims=True)          # complex -> E[|x - mean|^2], real
    std = jnp.sqrt(var + eps)
    xn = (xf - mean) / std
    y = jnp.real(jnp.fft.ifft(xn, axis=-1))
    return y * w + b, mean, std


def _ref_denorm(x, w, b, eps, mean, std):
    x = (x - b) / (w + eps * eps)
    xf = jnp.fft.fft(x, axis=-1)
    xf = xf * std + mean
    return jnp.real(jnp.fft.ifft(xf, axis=-1))


# ----------------------------- main --------------------------------------------


if __name__ == "__main__":
    B, T, C = 8, 16, 16
    key = jax.random.PRNGKey(0)
    x = jax.random.normal(key, (B, T, C), dtype=jnp.float32)

    revin = RevINFreqPallas(num_features=C, eps=1e-5, affine=True)

    # mode='norm'
    y_norm = revin(x, "norm")
    y_norm = jax.block_until_ready(y_norm)

    # mode='denorm' (applied to the normalized signal, the typical usage)
    y_denorm = revin(y_norm, "denorm")
    y_denorm = jax.block_until_ready(y_denorm)

    # --- verify against a pure-JAX reference of the PyTorch semantics ---
    w = revin.affine_weight
    b = revin.affine_bias
    y_ref, mean_ref, std_ref = _ref_norm(x, w, b, 1e-5)
    yd_ref = _ref_denorm(y_ref, w, b, 1e-5, mean_ref, std_ref)

    assert jnp.allclose(y_norm, y_ref, atol=2e-3, rtol=2e-3)
    assert jnp.allclose(revin.stdev, jnp.asarray(std_ref, jnp.float32),
                        atol=2e-3, rtol=2e-3)
    assert jnp.allclose(jnp.real(revin.mean), jnp.real(mean_ref), atol=2e-3, rtol=2e-3)
    assert jnp.allclose(jnp.imag(revin.mean), jnp.imag(mean_ref), atol=2e-3, rtol=2e-3)
    assert jnp.allclose(y_denorm, yd_ref, atol=2e-3, rtol=2e-3)

    print("KERNEL_OK")
</pallas_src>

<mosaic_0001>
module attributes {stable_mosaic.version = 11 : i64} {
  func.func @_norm_kernel(%arg0: i32, %arg1: memref<4x16x16xf32, #tpu.memory_space<vmem>>, %arg2: memref<16x32xf32, #tpu.memory_space<vmem>>, %arg3: memref<32x16xf32, #tpu.memory_space<vmem>>, %arg4: memref<1x16xf32, #tpu.memory_space<vmem>>, %arg5: memref<4x16x16xf32, #tpu.memory_space<vmem>>, %arg6: memref<4x1x32xf32, #tpu.memory_space<vmem>>, %arg7: memref<4x1x16xf32, #tpu.memory_space<vmem>>) attributes {dimension_semantics = [#tpu.dimension_semantics<parallel>], iteration_bounds = array<i64: 2>, scalar_prefetch = 0 : i64, scratch_operands = 0 : i64, tpu.core_type = #tpu.core_type<tc>, window_params = [{transform_indices = @transform_0, window_bounds = array<i64: 4, 16, 16>}, {pipeline_mode = #tpu.pipeline_mode<synchronous>, transform_indices = @transform_1, window_bounds = array<i64: 16, 32>}, {pipeline_mode = #tpu.pipeline_mode<synchronous>, transform_indices = @transform_2, window_bounds = array<i64: 32, 16>}, {pipeline_mode = #tpu.pipeline_mode<synchronous>, transform_indices = @transform_3, window_bounds = array<i64: 1, 16>}, {transform_indices = @transform_4, window_bounds = array<i64: 4, 16, 16>}, {transform_indices = @transform_5, window_bounds = array<i64: 4, 1, 32>}, {transform_indices = @transform_6, window_bounds = array<i64: 4, 1, 16>}]} {
    %c0 = arith.constant 0 : index
    %c0_0 = arith.constant 0 : index
    %c0_1 = arith.constant 0 : index
    %0 = vector.load %arg1[%c0, %c0_0, %c0_1] : memref<4x16x16xf32, #tpu.memory_space<vmem>>, vector<4x16x16xf32>
    %1 = vector.shape_cast %0 : vector<4x16x16xf32> to vector<64x16xf32>
    %c0_2 = arith.constant 0 : index
    %c0_3 = arith.constant 0 : index
    %2 = vector.load %arg2[%c0_2, %c0_3] : memref<16x32xf32, #tpu.memory_space<vmem>>, vector<16x32xf32>
    %cst = arith.constant dense<0.000000e+00> : vector<64x32xf32>
    %3 = tpu.matmul %1, %2, %cst {dimension_numbers = #tpu.dot_dimension_numbers<[1], [0], [0], [1], [0, 0, 1, 1], [], []>} : vector<64x16xf32>, vector<16x32xf32>, vector<64x32xf32> -> vector<64x32xf32>
    %4 = vector.shape_cast %3 : vector<64x32xf32> to vector<4x16x32xf32>
    %cst_4 = arith.constant dense<0.000000e+00> : vector<4x32xf32>
    %5 = vector.multi_reduction <add>, %4, %cst_4 [1] : vector<4x16x32xf32> to vector<4x32xf32>
    %6 = vector.shape_cast %5 : vector<4x32xf32> to vector<4x1x32xf32>
    %cst_5 = arith.constant 1.600000e+01 : f32
    %7 = vector.broadcast %cst_5 : f32 to vector<4x1x32xf32>
    %8 = arith.divf %6, %7 : vector<4x1x32xf32>
    %9 = vector.broadcast %8 : vector<4x1x32xf32> to vector<4x16x32xf32>
    %10 = arith.subf %4, %9 : vector<4x16x32xf32>
    %11 = arith.mulf %10, %10 : vector<4x16x32xf32>
    %cst_6 = arith.constant dense<0.000000e+00> : vector<4x32xf32>
    %12 = vector.multi_reduction <add>, %11, %cst_6 [1] : vector<4x16x32xf32> to vector<4x32xf32>
    %13 = vector.shape_cast %12 : vector<4x32xf32> to vector<4x1x32xf32>
    %cst_7 = arith.constant 1.600000e+01 : f32
    %14 = vector.broadcast %cst_7 : f32 to vector<4x1x32xf32>
    %15 = arith.divf %13, %14 : vector<4x1x32xf32>
    %16 = vector.extract_strided_slice %15 {offsets = [0, 0, 0], sizes = [4, 1, 16], strides = [1, 1, 1]} : vector<4x1x32xf32> to vector<4x1x16xf32>
    %17 = vector.extract_strided_slice %15 {offsets = [0, 0, 16], sizes = [4, 1, 16], strides = [1, 1, 1]} : vector<4x1x32xf32> to vector<4x1x16xf32>
    %18 = arith.addf %16, %17 : vector<4x1x16xf32>
    %cst_8 = arith.constant 9.99999974E-6 : f32
    %19 = vector.broadcast %cst_8 : f32 to vector<4x1x16xf32>
    %20 = arith.addf %18, %19 : vector<4x1x16xf32>
    %21 = math.rsqrt %20 : vector<4x1x16xf32>
    %22 = arith.mulf %20, %21 : vector<4x1x16xf32>
    %23 = tpu.concatenate %21, %21 in 2 : vector<4x1x16xf32>, vector<4x1x16xf32> -> vector<4x1x32xf32>
    %24 = vector.broadcast %23 : vector<4x1x32xf32> to vector<4x16x32xf32>
    %25 = arith.mulf %10, %24 : vector<4x16x32xf32>
    %26 = vector.shape_cast %25 : vector<4x16x32xf32> to vector<64x32xf32>
    %c0_9 = arith.constant 0 : index
    %c0_10 = arith.constant 0 : index
    %27 = vector.load %arg3[%c0_9, %c0_10] : memref<32x16xf32, #tpu.memory_space<vmem>>, vector<32x16xf32>
    %cst_11 = arith.constant dense<0.000000e+00> : vector<64x16xf32>
    %28 = tpu.matmul %26, %27, %cst_11 {dimension_numbers = #tpu.dot_dimension_numbers<[1], [0], [0], [1], [0, 0, 1, 1], [], []>} : vector<64x32xf32>, vector<32x16xf32>, vector<64x16xf32> -> vector<64x16xf32>
    %29 = vector.shape_cast %28 : vector<64x16xf32> to vector<4x16x16xf32>
    %c0_12 = arith.constant 0 : index
    %c0_13 = arith.constant 0 : index
    %30 = vector.load %arg4[%c0_12, %c0_13] : memref<1x16xf32, #tpu.memory_space<vmem>>, vector<1x16xf32>
    %31 = vector.shape_cast %30 : vector<1x16xf32> to vector<1x1x16xf32>
    %32 = vector.broadcast %31 : vector<1x1x16xf32> to vector<4x16x16xf32>
    %33 = arith.addf %29, %32 : vector<4x16x16xf32>
    %c0_14 = arith.constant 0 : index
    %c0_15 = arith.constant 0 : index
    %c0_16 = arith.constant 0 : index
    %34 = vector.load %arg5[%c0_14, %c0_15, %c0_16] : memref<4x16x16xf32, #tpu.memory_space<vmem>>, vector<4x16x16xf32>
    tpu.vector_store %arg5[%c0_14, %c0_15, %c0_16], %33 {strides = array<i32>} : memref<4x16x16xf32, #tpu.memory_space<vmem>>, vector<4x16x16xf32>,
    %c0_17 = arith.constant 0 : index
    %c0_18 = arith.constant 0 : index
    %c0_19 = arith.constant 0 : index
    %35 = vector.load %arg6[%c0_17, %c0_18, %c0_19] : memref<4x1x32xf32, #tpu.memory_space<vmem>>, vector<4x1x32xf32>
    tpu.vector_store %arg6[%c0_17, %c0_18, %c0_19], %8 {strides = array<i32>} : memref<4x1x32xf32, #tpu.memory_space<vmem>>, vector<4x1x32xf32>,
    %c0_20 = arith.constant 0 : index
    %c0_21 = arith.constant 0 : index
    %c0_22 = arith.constant 0 : index
    %36 = vector.load %arg7[%c0_20, %c0_21, %c0_22] : memref<4x1x16xf32, #tpu.memory_space<vmem>>, vector<4x1x16xf32>
    tpu.vector_store %arg7[%c0_20, %c0_21, %c0_22], %22 {strides = array<i32>} : memref<4x1x16xf32, #tpu.memory_space<vmem>>, vector<4x1x16xf32>,
    return
  }
  func.func @transform_0(%arg0: i32) -> (i32, i32, i32) {
    %c0_i32 = arith.constant 0 : i32
    %c0_i32_0 = arith.constant 0 : i32
    %c0_i32_1 = arith.constant 0 : i32
    return %arg0, %c0_i32, %c0_i32_0 : i32, i32, i32
  }
  func.func @transform_1(%arg0: i32) -> (i32, i32) {
    %c0_i32 = arith.constant 0 : i32
    %c0_i32_0 = arith.constant 0 : i32
    %c0_i32_1 = arith.constant 0 : i32
    return %c0_i32, %c0_i32_0 : i32, i32
  }
  func.func @transform_2(%arg0: i32) -> (i32, i32) {
    %c0_i32 = arith.constant 0 : i32
    %c0_i32_0 = arith.constant 0 : i32
    %c0_i32_1 = arith.constant 0 : i32
    return %c0_i32, %c0_i32_0 : i32, i32
  }
  func.func @transform_3(%arg0: i32) -> (i32, i32) {
    %c0_i32 = arith.constant 0 : i32
    %c0_i32_0 = arith.constant 0 : i32
    %c0_i32_1 = arith.constant 0 : i32
    return %c0_i32, %c0_i32_0 : i32, i32
  }
  func.func @transform_4(%arg0: i32) -> (i32, i32, i32) {
    %c0_i32 = arith.constant 0 : i32
    %c0_i32_0 = arith.constant 0 : i32
    %c0_i32_1 = arith.constant 0 : i32
    return %arg0, %c0_i32, %c0_i32_0 : i32, i32, i32
  }
  func.func @transform_5(%arg0: i32) -> (i32, i32, i32) {
    %c0_i32 = arith.constant 0 : i32
    %c0_i32_0 = arith.constant 0 : i32
    %c0_i32_1 = arith.constant 0 : i32
    return %arg0, %c0_i32, %c0_i32_0 : i32, i32, i32
  }
  func.func @transform_6(%arg0: i32) -> (i32, i32, i32) {
    %c0_i32 = arith.constant 0 : i32
    %c0_i32_0 = arith.constant 0 : i32
    %c0_i32_1 = arith.constant 0 : i32
    return %arg0, %c0_i32, %c0_i32_0 : i32, i32, i32
  }
}

</mosaic_0001>

<bundles_post_ra>
// kernel: tpu_custom_call.1
= control target key start
LH: loop header
LB: loop body
LE: loop exit
PB: predicated region body
PF: predicated region fallthrough
CT: control target
= control target key end

     0   :  { %12 = vsyncpa [#allocation3], 0  ;;  %s1700_s0 = inlined_call_operand.hbm [shape: f32[8,16,16], index: 0, kind: input, shape index: {}]   ;;  %s1701_s1 = inlined_call_operand.vmem [shape: f32[16,32], index: 1, kind: input, shape index: {}]   ;;  %s1702_s2 = inlined_call_operand.vmem [shape: f32[32,16], index: 2, kind: input, shape index: {}]   ;;  %s1703_s3 = inlined_call_operand.vmem [shape: f32[1,16], index: 3, kind: input, shape index: {}]   ;;  %s1704_s4 = inlined_call_operand.hbm [shape: f32[8,16,16], index: 4, kind: output, shape index: {0}]   ;;  %s1705_s5 = inlined_call_operand.hbm [shape: f32[8,1,32], index: 5, kind: output, shape index: {1}]   ;;  %s1706_s6 = inlined_call_operand.hbm [shape: f32[8,1,16], index: 6, kind: output, shape index: {2}]  }
   0x1   :  { %14 = vsyncpa [#allocation3 + $0x1], 0 }
   0x2   :  { %15 = vsyncpa [#allocation4], 0 }
   0x3   :  { %17 = vsyncpa [#allocation4 + $0x1], 0 }
   0x4   :  { %18 = vsyncpa [#allocation7], 0 }
   0x5   :  { %20 = vsyncpa [#allocation7 + $0x1], 0  ;;  %s1336_s21 = smov 0   ;;  %s1338_s22 = smov 0  }
   0x6   :  { %s1340_s23 = smov 0   ;;  %s1342_s24 = smov 0  }
   0x7 LB: > { %s1357_s25 = sadd.s32 4294967295, %s1288_s24   ;;  %s1709_s26 = sadd.s32 4294967294, %s1288_s24   ;;  %s1288_s24 = sphi %s1342_s24, %s1730_s24   ;;  %s1284_s23 = sphi %s1340_s23, %s1729_s23   ;;  %s1280_s22 = sphi %s1338_s22, %s1728_s22   ;;  %s1276_s21 = sphi %s1336_s21, %s1727_s21  }
   0x8   : > { %s1361_s27 = sadd.s32 1, %s1288_s24   ;;  %s33_s28 = sadd.s32 1, %s1284_s23 }
   0x9   : > { %s30_s29 = ssub.s32 %s1288_s24, %s1361_s27  ;;  %p40_p0 = scmp.ne.s32.totalorder %s1284_s23, %s1280_s22 }
   0xa   : > { %p31_p1 = scmp.eq.s32.totalorder %s30_s29, 0  ;;  %p41_p2 = scmp.eq.s32.totalorder %s1288_s24, 0 }
   0xb   : > { %p46_p3 = scmp.ne.s32.totalorder %s1280_s22, %s1276_s21  ;;  %p47_p4 = scmp.eq.s32.totalorder %s1357_s25, 0 }
   0xc   : > { %s1373_s30 = scalar_select %p31_p1, %s1284_s23, %s33_s28  }
   0xd   : > { %p1375_p5 = por %p41_p2, %p40_p0  ;;  %p1379_p6 = por %p47_p4, %p46_p3 }
   0xe   : > { %p133_p7 = scmp.eq.s32.totalorder %s1357_s25, 1  ;;  %p139_p8 = scmp.eq.s32.totalorder %s1709_s26, 1 }
   0xf   : > { %s1714_s8 = scalar_select %p1379_p6, 1, 0 }
  0x10   : > { %p1091_p10 = scmp.lt.s32.totalorder %s1288_s24, 2  ;;  %p1388_p11 = por %p133_p7, %p40_p0 }
  0x11   : > { %p1392_p12 = por %p139_p8, %p46_p3  ;;  %s220_s11 = sand.u32 1, %s1284_s23  }
  0x12   : > { %s1715_s9 = scalar_select %p1388_p11, 1, 0 }
  0x13   : > { %s1716_s10 = scalar_select %p1392_p12, 1, 0 }
  0x14   : > { %s1006_s12 = sshll.u32 %s1288_s24, 10  ;;  %s967_s13 = sshll.u32 %s220_s11, 6 }
  0x15   : > { %s1401_s16 = scalar_lea.hbm %s1700_s0, %s1006_s12  ;;  %s224_s17 = scalar_lea.vmem [#allocation2], %s967_s13 }
  0x16   : > { %s232_s18 = sshll.u32 %s224_s17, 4  ;;  %p1405_p13 = pnand %p1091_p10, %p1375_p5  ;;  %s1409_s18 = int_to_ptr.vmem [resolvable:$true] %s232_s18 }
  0x17   : > { %s1411_s20 = scalar_lea.sflag [#allocation3], %s220_s11  ;;  %s1140_s28 = scalar_lea.hbm %s1401_s16, 1024 }
  0x18   : > { %p1141_p0 = scmp.ne.s32.totalorder %s1401_s16, %s1140_s28  ;;  %p1142_p1 = pneg %p1405_p13 }
  0x19   : > { %s1145_s13 = scalar_lea.hbm %s1700_s0, 2048  ;;  %p1146_p4 = scmp.lt.s32.totalorder %s1401_s16, %s1700_s0 }
  0x1a   : > { %p1143_p2 = pnand %p1142_p1, %p1141_p0  ;;  %p1147_p5 = scmp.lt.s32.totalorder %s1145_s13, %s1140_s28 }
  0x1c   : > { %p1144_p3 = pneg %p1143_p2  ;;  %p1148_p7 = por %p1147_p5, %p1146_p4 }
  0x1e   : > { %p1149_p8 = pnand %p1148_p7, %p1144_p3 }
  0x20   : > { %1152 = shalt.err (!%p1149_p8)
}
  0x21   : > { %s1153_s11 = scalar_lea.vmem %s1409_s18, 1024  ;;  %s1290_s15 = smov [#allocation2]  }
  0x22   : > { %p1154_p10 = scmp.ne.s32.totalorder %s1409_s18, %s1153_s11  ;;  %s1158_s17 = sshll.u32 %s1290_s15, 4  ;;  %s1159_s17 = int_to_ptr.vmem [resolvable:$false] %s1158_s17 }
  0x23   : > { %s1160_s29 = scalar_lea.vmem %s1159_s17, 2048  ;;  %p1161_p2 = scmp.lt.s32.totalorder %s1409_s18, %s1159_s17 }
  0x24   : > { %p1156_p9 = pnand %p1154_p10, %p1142_p1  ;;  %p1162_p12 = scmp.lt.s32.totalorder %s1160_s29, %s1153_s11 }
  0x26   : > { %p1157_p0 = pneg %p1156_p9  ;;  %p1163_p11 = por %p1162_p12, %p1161_p2 }
  0x28   : > { %p1164_p6 = pnand %p1163_p11, %p1157_p0 }
  0x2a   : > { %1167 = shalt.err (!%p1164_p6)
}
  0x2b   : > { %s1291_s28 = smov 128   ;;  %s1292_s12 = smov 8  }
  0x2c   : > { %1080 = dma.hbm_to_vmem [thread:$0]  (!%p1405_p13), %s1401_s16, 1024, %s1409_s18, %s1411_s20, %s1291_s28, %s1291_s28, %s1292_s12  }
  0x2d   : > { %p971_p9 = scmp.ge.s32.totalorder %s1288_s24, 1  ;;  %p240_p1 = scmp.lt.s32.totalorder %s1288_s24, 3 }
  0x2f   : > { %p241_p3 = pnand %p971_p9, %p240_p1 }
  0x30   : > { %s1435_s13 = sand.u32 (!%p241_p3), 1, %s1280_s22   ;;  %p1718_p6 = scmp.ne.s32.totalorder (!%p241_p3), %s1714_s8, 0 }
  0x31   : > { %244 = sbr.rel (%p241_p3) target bundleno = 771 (0x303), region = 36  ;;  %s1710_s7 = sshll.u32 (!%p241_p3), %s1435_s13, 6 }
  0x32   : > { %s247_s14 = scalar_lea.sflag (!%p241_p3), [#allocation3], %s1435_s13  ;;  %s250_s11 = scalar_lea.vmem (!%p241_p3), [#allocation2], %s1710_s7 }
  0x36   : > { %1263 = dma.done.wait (%p1718_p6), %s247_s14, 1024  }
  0x37   : > { %1265 = vsyncadd (%p1718_p6), %s247_s14, 4294966272  ;;  %vm303_vm0 = vcmask 130048   ;;  %v302_v0 = vld [vmem:[%s1701_s1 + $0x8] sm:$0xff]  ;;  %v301_v1 = vld [vmem:[%s1701_s1] sm:$0xff]  ;;  %vm433_vm1 = vcmask 261120   ;;  %s974_s8 = sshll.u32 %s1435_s13, 2 }
  0x38   : > { %v293_v2 = vld [vmem:[%s250_s11] sm:$0xff]  ;;  %1033 = vmatprep.subr.mxu0 %v302_v0  ;;  %v294_v3 = vld [vmem:[%s250_s11 + $0x8] sm:$0xff]  ;;  %v295_v4 = vld [vmem:[%s250_s11 + $0x10] sm:$0xff]  ;;  %vm763_vm2 = vcmask 253952   ;;  %s1474_s15 = scalar_lea.vmem [#allocation6], %s974_s8  ;;  %s1293_s17 = smov 112  }
  0x39   : > { %1037 = vmatprep.mubr.msk.f32.mxu0 %vm303_vm0, %v293_v2  ;;  %1034 = vmatpush3.msra.mxu0 %v302_v0  ;;  %v296_v5 = vld [vmem:[%s250_s11 + $0x18] sm:$0xff]  ;;  %v297_v6 = vld [vmem:[%s250_s11 + $0x20] sm:$0xff]  ;;  %v298_v7 = vld [vmem:[%s250_s11 + $0x28] sm:$0xff]  ;;  %vm768_vm3 = vcmask 122880   ;;  %s1712_s20 = smov 16   ;;  %s1711_s29 = sshll.u32 %s1357_s25, 6 }
  0x3a   : > { %1035 = vmatprep.subr.mxu0 %v301_v1  ;;  %v299_v8 = vld [vmem:[%s250_s11 + $0x30] sm:$0xff]  ;;  %v300_v9 = vld [vmem:[%s250_s11 + $0x38] sm:$0xff]  ;;  %s1575_s14 = scalar_lea.hbm %s1705_s5, %s1711_s29  ;;  %s814_s11 = sshll.u32 %s1474_s15, 4  ;;  %s1579_s11 = int_to_ptr.vmem [resolvable:$true] %s814_s11 }
  0x3b   : > { %1036 = vmatpush3.msra.mxu0 %v301_v1  ;;  %s1168_s19 = scalar_lea.vmem %s1579_s11, 64  ;;  %p1719_p12 = scmp.ne.s32.totalorder %s1715_s9, 0 }
  0x3c   : > { %1038 = vmatmul.mubr.msk.f32.vlgmr.msra.gmra.mxu0 %vm303_vm0, %v294_v3  ;;  %p1169_p11 = scmp.ne.s32.totalorder %s1579_s11, %s1168_s19  ;;  %s1295_s26 = smov [#allocation6]  }
  0x3d   : > { %1040 = vmatprep.mubr.msk.f32.mxu0 %vm303_vm0, %v295_v4  ;;  %s1172_s7 = sshll.u32 %s1295_s26, 4  ;;  %s1173_s7 = int_to_ptr.vmem [resolvable:$false] %s1172_s7 }
  0x3e   : > { %p1170_p13 = pnand %p1169_p11, %p1719_p12  ;;  %s1174_s28 = scalar_lea.vmem %s1173_s7, 128 }
  0x3f   : > { %p1175_p5 = scmp.lt.s32.totalorder %s1579_s11, %s1173_s7  ;;  %p1176_p7 = scmp.lt.s32.totalorder %s1174_s28, %s1168_s19 }
  0x40   : > { %1041 = vmatmul.mubr.msk.f32.gmra.mxu0 %vm303_vm0, %v296_v5  ;;  %p1171_p4 = pneg %p1170_p13 }
  0x41   : > { %1043 = vmatprep.mubr.msk.f32.mxu0 %vm303_vm0, %v297_v6  ;;  %p1177_p8 = por %p1176_p7, %p1175_p5 }
  0x43   : > { %p1178_p10 = pnand %p1177_p8, %p1171_p4 }
  0x44   : > { %1044 = vmatmul.mubr.msk.f32.gmra.mxu0 %vm303_vm0, %v298_v7 }
  0x45   : > { %1046 = vmatprep.mubr.msk.f32.mxu0 %vm303_vm0, %v299_v8 }
  0x48   : > { %1047 = vmatmul.mubr.msk.f32.gmra.mxu0 %vm303_vm0, %v300_v9 }
  0xfc   : > { %v1039_v10 = vpop.f32.mrf.mxu0 }
  0xfd   : > { %v435_v12 = vsel %vm433_vm1, %v1039_v10, 0.0 }
  0xfe   : > { %v394_v11 = vpop.f32.mrf.mxu0 }
  0xff   : > { %v434_v13 = vsel %vm433_vm1, %v394_v11, 0.0 }
 0x100   : > { %v436_v14 = vadd.f32 %v435_v12, %v434_v13  ;;  %v1042_v15 = vpop.f32.mrf.mxu0 }
 0x101   : > { %v444_v18 = vsel %vm433_vm1, %v1042_v15, 0.0 }
 0x102   : > { %v437_v16 = vrot.slane %v436_v14, 4  ;;  %v404_v17 = vpop.f32.mrf.mxu0 }
 0x103   : > { %v443_v19 = vsel %vm433_vm1, %v404_v17, 0.0 }
 0x104   : > { %v438_v20 = vadd.f32 %v437_v16, %v436_v14  ;;  %v445_v21 = vadd.f32 %v444_v18, %v443_v19  ;;  %v1045_v22 = vpop.f32.mrf.mxu0 }
 0x105   : > { %v453_v26 = vsel %vm433_vm1, %v1045_v22, 0.0 }
 0x106   : > { %v439_v23 = vrot.slane %v438_v20, 2  ;;  %v446_v24 = vrot.slane %v445_v21, 4  ;;  %v414_v25 = vpop.f32.mrf.mxu0 }
 0x107   : > { %v452_v27 = vsel %vm433_vm1, %v414_v25, 0.0 }
 0x108   : > { %v440_v28 = vadd.f32 %v439_v23, %v438_v20  ;;  %v447_v29 = vadd.f32 %v446_v24, %v445_v21  ;;  %v454_v30 = vadd.f32 %v453_v26, %v452_v27  ;;  %v1048_v31 = vpop.f32.mrf.mxu0 }
 0x109   : > { %v462_v36 = vsel %vm433_vm1, %v1048_v31, 0.0 }
 0x10a   : > { %v441_v32 = vrot.slane %v440_v28, 1  ;;  %v448_v33 = vrot.slane %v447_v29, 2  ;;  %v455_v34 = vrot.slane %v454_v30, 4  ;;  %v424_v35 = vpop.f32.mrf.mxu0 }
 0x10b   : > { %v461_v37 = vsel %vm433_vm1, %v424_v35, 0.0 }
 0x10c   : > { %v442_v38 = vadd.f32 %v441_v32, %v440_v28  ;;  %v449_v39 = vadd.f32 %v448_v33, %v447_v29  ;;  %v456_v40 = vadd.f32 %v455_v34, %v454_v30  ;;  %v463_v41 = vadd.f32 %v462_v36, %v461_v37 }
 0x10e   : > { %v471_v42 = vmul.f32 0.0625, %v442_v38  ;;  %v450_v43 = vrot.slane %v449_v39, 1  ;;  %v457_v44 = vrot.slane %v456_v40, 2  ;;  %v464_v45 = vrot.slane %v463_v41, 4 }
 0x110   : > { %v1468_v46 = vsub.f32 %v394_v11, %v471_v42  ;;  %v1470_v47 = vsub.f32 %v1039_v10, %v471_v42  ;;  %764 = vst.msk [vmem:[%s1474_s15] sm:$0x1] %vm763_vm2, %v471_v42  ;;  %v451_v48 = vadd.f32 %v450_v43, %v449_v39  ;;  %v458_v49 = vadd.f32 %v457_v44, %v456_v40 }
 0x111   : > { %v465_v50 = vadd.f32 %v464_v45, %v463_v41 }
 0x112   : > { %v483_v51 = vmul.f32 %v1468_v46, %v1468_v46  ;;  %v484_v52 = vmul.f32 %v1470_v47, %v1470_v47  ;;  %v472_v53 = vmul.f32 0.0625, %v451_v48  ;;  %v459_v54 = vrot.slane %v458_v49, 1 }
 0x113   : > { %v466_v55 = vrot.slane %v465_v50, 2 }
 0x114   : > { %v491_v56 = vsel %vm433_vm1, %v483_v51, 0.0  ;;  %v492_v57 = vsel %vm433_vm1, %v484_v52, 0.0  ;;  %v1484_v58 = vsub.f32 %v404_v17, %v472_v53  ;;  %v1486_v59 = vsub.f32 %v1042_v15, %v472_v53  ;;  %765 = vst.msk [vmem:[%s1474_s15 + $0x1] sm:$0x1] %vm763_vm2, %v472_v53  ;;  %v610_v52 = vld [vmem:[%s1702_s2 + $0x18] sm:$0xff] }
 0x115   : > { %v493_v60 = vadd.f32 %v492_v57, %v491_v56  ;;  %v460_v61 = vadd.f32 %v459_v54, %v458_v49  ;;  %v467_v62 = vadd.f32 %v466_v55, %v465_v50  ;;  %1049 = vmatprep.subr.mxu1 %v610_v52 }
 0x116   : > { %v485_v63 = vmul.f32 %v1484_v58, %v1484_v58  ;;  %v486_v0 = vmul.f32 %v1486_v59, %v1486_v59  ;;  %1050 = vmatpush3.msra.mxu1 %v610_v52 }
 0x117   : > { %v473_v1 = vmul.f32 0.0625, %v460_v61  ;;  %v468_v2 = vrot.slane %v467_v62, 1  ;;  %v494_v3 = vrot.slane %v493_v60, 4 }
 0x118   : > { %v500_v4 = vsel %vm433_vm1, %v485_v63, 0.0  ;;  %v501_v5 = vsel %vm433_vm1, %v486_v0, 0.0 }
 0x119   : > { %v502_v6 = vadd.f32 %v501_v5, %v500_v4  ;;  %v1496_v7 = vsub.f32 %v414_v25, %v473_v1  ;;  %v1498_v8 = vsub.f32 %v1045_v22, %v473_v1  ;;  %766 = vst.msk [vmem:[%s1474_s15 + $0x2] sm:$0x1] %vm763_vm2, %v473_v1  ;;  %v469_v9 = vadd.f32 %v468_v2, %v467_v62  ;;  %v608_v62 = vld [vmem:[%s1702_s2 + $0x8] sm:$0xff]  ;;  %v607_v1 = vld [vmem:[%s1702_s2] sm:$0xff] }
 0x11a   : > { %v495_v10 = vadd.f32 %v494_v3, %v493_v60  ;;  %v609_v60 = vld [vmem:[%s1702_s2 + $0x10] sm:$0xff] }
 0x11b   : > { %v503_v11 = vrot.slane %v502_v6, 4  ;;  %v487_v12 = vmul.f32 %v1496_v7, %v1496_v7  ;;  %v488_v13 = vmul.f32 %v1498_v8, %v1498_v8  ;;  %v474_v14 = vmul.f32 0.0625, %v469_v9  ;;  %1051 = vmatprep.subr.mxu1 %v609_v60 }
 0x11c   : > { %v496_v15 = vrot.slane %v495_v10, 2  ;;  %1052 = vmatpush3.msra.mxu1 %v609_v60 }
 0x11d   : > { %v509_v16 = vsel %vm433_vm1, %v487_v12, 0.0  ;;  %v510_v17 = vsel %vm433_vm1, %v488_v13, 0.0  ;;  %v1508_v18 = vsub.f32 %v424_v35, %v474_v14  ;;  %v1510_v19 = vsub.f32 %v1048_v31, %v474_v14  ;;  %767 = vst.msk [vmem:[%s1474_s15 + $0x3] sm:$0x1] %vm763_vm2, %v474_v14  ;;  %1053 = vmatprep.subr.mxu1 %v608_v62 }
 0x11e   : > { %v511_v20 = vadd.f32 %v510_v17, %v509_v16  ;;  %v497_v21 = vadd.f32 %v496_v15, %v495_v10  ;;  %v504_v22 = vadd.f32 %v503_v11, %v502_v6  ;;  %1054 = vmatpush3.msra.mxu1 %v608_v62  ;;  %v583_v16 = vlaneseq }
 0x11f   : > { %v489_v23 = vmul.f32 %v1508_v18, %v1508_v18  ;;  %v490_v24 = vmul.f32 %v1510_v19, %v1510_v19  ;;  %1055 = vmatprep.subr.mxu1 %v607_v1 }
 0x120   : > { %v498_v25 = vrot.slane %v497_v21, 1  ;;  %v505_v26 = vrot.slane %v504_v22, 2  ;;  %v512_v27 = vrot.slane %v511_v20, 4  ;;  %1056 = vmatpush3.msra.mxu1 %v607_v1  ;;  %v584_v17 = vshrl.u32 %v583_v16, 7 }
 0x121   : > { %v518_v28 = vsel %vm433_vm1, %v489_v23, 0.0  ;;  %v519_v29 = vsel %vm433_vm1, %v490_v24, 0.0 }
 0x122   : > { %v520_v30 = vadd.f32 %v519_v29, %v518_v28  ;;  %v499_v31 = vadd.f32 %v498_v25, %v497_v21  ;;  %v506_v32 = vadd.f32 %v505_v26, %v504_v22  ;;  %v513_v33 = vadd.f32 %v512_v27, %v511_v20 }
 0x123   : > { %v585_v20 = vsub.s32 0, %v584_v17 }
 0x124   : > { %v521_v34 = vrot.slane %v520_v30, 4  ;;  %v527_v35 = vmul.f32 0.0625, %v499_v31  ;;  %v507_v36 = vrot.slane %v506_v32, 1  ;;  %v514_v37 = vrot.slane %v513_v33, 2 }
 0x126   : > { %v522_v38 = vadd.f32 %v521_v34, %v520_v30  ;;  %535 = vrot.lane.b32.xlu0 %v527_v35, %s1293_s17  ;;  %v508_v39 = vadd.f32 %v507_v36, %v506_v32  ;;  %v515_v40 = vadd.f32 %v514_v37, %v513_v33 }
 0x128   : > { %v528_v41 = vmul.f32 0.0625, %v508_v39  ;;  %v516_v42 = vrot.slane %v515_v40, 1  ;;  %v523_v43 = vrot.slane %v522_v38, 2 }
 0x12a   : > { %537 = vrot.lane.b32.xlu0 %v528_v41, %s1293_s17  ;;  %v517_v44 = vadd.f32 %v516_v42, %v515_v40  ;;  %v524_v45 = vadd.f32 %v523_v43, %v522_v38 }
 0x12c   : > { %v529_v48 = vmul.f32 0.0625, %v517_v44  ;;  %v525_v49 = vrot.slane %v524_v45, 1 }
 0x12e   : > { %539 = vrot.lane.b32.xlu1 %v529_v48, %s1293_s17  ;;  %v526_v50 = vadd.f32 %v525_v49, %v524_v45 }
 0x130   : > { %v530_v51 = vmul.f32 0.0625, %v526_v50 }
 0x132   : > { %541 = vrot.lane.b32.xlu1 %v530_v51, %s1293_s17  ;;  %s1535_s17 = scalar_lea.vmem [#allocation8], %s974_s8  ;;  %s778_s8 = sand.u32 1, %s1357_s25  }
 0x133   : > { %s1581_s18 = scalar_lea.sflag [#allocation7], %s778_s8 }
 0x198   : > { %v536_v53 = vpop.permute.xlu0 %535 }
 0x199   : > { %v547_v54 = vadd.f32 %v536_v53, %v527_v35 }
 0x19b   : > { %v551_v55 = vadd.f32 1e-05, %v547_v54 }
 0x19c   : > { %v538_v56 = vpop.permute.xlu0 %537 }
 0x19d   : > { %1132 = vrsqrt.f32 %v551_v55  ;;  %v548_v57 = vadd.f32 %v538_v56, %v528_v41 }
 0x19f   : > { %v552_v61 = vadd.f32 1e-05, %v548_v57 }
 0x1a0   : > { %v540_v63 = vpop.permute.xlu1 %539 }
 0x1a1   : > { %1134 = vrsqrt.f32 %v552_v61  ;;  %v549_v0 = vadd.f32 %v540_v63, %v529_v48 }
 0x1a3   : > { %v553_v2 = vadd.f32 1e-05, %v549_v0 }
 0x1a4   : > { %v542_v3 = vpop.permute.xlu1 %541 }
 0x1a5   : > { %1136 = vrsqrt.f32 %v553_v2  ;;  %v550_v4 = vadd.f32 %v542_v3, %v530_v51 }
 0x1a7   : > { %v554_v5 = vadd.f32 1e-05, %v550_v4 }
 0x1a9   : > { %1138 = vrsqrt.f32 %v554_v5 }
 0x1aa   : > { %v1133_v6 = vpop.eup %1132 }
 0x1ab   : > { %v559_v9 = vmul.f32 %v1133_v6, %v551_v55  ;;  %567 = vrot.lane.b32.xlu0 %v1133_v6, %s1712_s20 }
 0x1ad   : > { %769 = vst.msk [vmem:[%s1535_s17] sm:$0x1] %vm768_vm3, %v559_v9 }
 0x1ae   : > { %v1135_v10 = vpop.eup %1134 }
 0x1af   : > { %v560_v11 = vmul.f32 %v1135_v10, %v552_v61  ;;  %569 = vrot.lane.b32.xlu1 %v1135_v10, %s1712_s20 }
 0x1b1   : > { %770 = vst.msk [vmem:[%s1535_s17 + $0x1] sm:$0x1] %vm768_vm3, %v560_v11 }
 0x1b2   : > { %v1137_v12 = vpop.eup %1136 }
 0x1b3   : > { %v561_v13 = vmul.f32 %v1137_v12, %v553_v2  ;;  %571 = vrot.lane.b32.xlu0 %v1137_v12, %s1712_s20 }
 0x1b5   : > { %771 = vst.msk [vmem:[%s1535_s17 + $0x2] sm:$0x1] %vm768_vm3, %v561_v13 }
 0x1b6   : > { %v1139_v14 = vpop.eup %1138 }
 0x1b7   : > { %v562_v15 = vmul.f32 %v1139_v14, %v554_v5  ;;  %573 = vrot.lane.b32.xlu1 %v1139_v14, %s1712_s20 }
 0x1b9   : > { %772 = vst.msk [vmem:[%s1535_s17 + $0x3] sm:$0x1] %vm768_vm3, %v562_v15 }
 0x21d   : > { %v568_v21 = vpop.permute.xlu0 %567 }
 0x21e   : > { %v579_v22 = vsel %vm303_vm0, %v1133_v6, %v568_v21 }
 0x21f   : > { %v586_v23 = vrot.slane %v579_v22, %v585_v20 }
 0x221   : > { %v600_v24 = vmul.f32 %v586_v23, %v1470_v47  ;;  %v570_v25 = vpop.permute.xlu1 %569  ;;  %v599_v26 = vmul.f32 %v586_v23, %v1468_v46 }
 0x222   : > { %v580_v27 = vsel %vm303_vm0, %v1135_v10, %v570_v25 }
 0x223   : > { %v590_v28 = vrot.slane %v580_v27, %v585_v20  ;;  %1057 = vmatprep.mubr.msk.f32.mxu1 %vm433_vm1, %v599_v26 }
 0x224   : > { %1058 = vmatmul.mubr.msk.f32.vlgmr.msra.gmra.mxu1 %vm433_vm1, %v600_v24 }
 0x225   : > { %v601_v29 = vmul.f32 %v590_v28, %v1484_v58  ;;  %v602_v30 = vmul.f32 %v590_v28, %v1486_v59  ;;  %v572_v31 = vpop.permute.xlu0 %571 }
 0x226   : > { %v581_v32 = vsel %vm303_vm0, %v1137_v12, %v572_v31 }
 0x227   : > { %v594_v47 = vrot.slane %v581_v32, %v585_v20  ;;  %1060 = vmatprep.mubr.msk.f32.mxu1 %vm433_vm1, %v601_v29 }
 0x228   : > { %1061 = vmatmul.mubr.msk.f32.gmra.mxu1 %vm433_vm1, %v602_v30 }
 0x229   : > { %v603_v46 = vmul.f32 %v594_v47, %v1496_v7  ;;  %v604_v33 = vmul.f32 %v594_v47, %v1498_v8  ;;  %v574_v58 = vpop.permute.xlu1 %573 }
 0x22a   : > { %v582_v59 = vsel %vm303_vm0, %v1139_v14, %v574_v58 }
 0x22b   : > { %v598_v34 = vrot.slane %v582_v59, %v585_v20  ;;  %1063 = vmatprep.mubr.msk.f32.mxu1 %vm433_vm1, %v603_v46 }
 0x22c   : > { %1064 = vmatmul.mubr.msk.f32.gmra.mxu1 %vm433_vm1, %v604_v33 }
 0x22d   : > { %v605_v35 = vmul.f32 %v598_v34, %v1508_v18  ;;  %v606_v36 = vmul.f32 %v598_v34, %v1510_v19 }
 0x22f   : > { %1066 = vmatprep.mubr.msk.f32.mxu1 %vm433_vm1, %v605_v35 }
 0x230   : > { %1067 = vmatmul.mubr.msk.f32.gmra.mxu1 %vm433_vm1, %v606_v36 }
 0x231   : > { %1181 = shalt.err (!%p1178_p10)
}
 0x232   : > { %s1182_s15 = scalar_lea.hbm %s1575_s14, 64  ;;  %s1186_s26 = scalar_lea.hbm %s1705_s5, 128 }
 0x233   : > { %p1183_p0 = scmp.ne.s32.totalorder %s1575_s14, %s1182_s15  ;;  %p1187_p1 = scmp.lt.s32.totalorder %s1575_s14, %s1705_s5 }
 0x234   : > { %p1188_p3 = scmp.lt.s32.totalorder %s1186_s26, %s1182_s15 }
 0x235   : > { %p1184_p2 = pnand %p1183_p0, %p1719_p12 }
 0x236   : > { %p1189_p6 = por %p1188_p3, %p1187_p1 }
 0x237   : > { %p1185_p9 = pneg %p1184_p2 }
 0x239   : > { %p1190_p11 = pnand %p1189_p6, %p1185_p9 }
 0x23b   : > { %1193 = shalt.err (!%p1190_p11)
}
 0x23c   : > { %s1296_s7 = smov 1   ;;  %s1720_s19 = sshll.u32 %s1535_s17, 4  ;;  %s1609_s19 = int_to_ptr.vmem [resolvable:$true] %s1720_s19 }
 0x23d   : > { %1072 = dma.vmem_to_hbm [thread:$0]  (%p1719_p12), %s1579_s11, 64, %s1575_s14, %s1581_s18, %s1712_s20, %s1712_s20, %s1296_s7  }
 0x23e   : > { %s1721_s29 = sshll.u32 %s1357_s25, 6  ;;  %s1194_s8 = scalar_lea.vmem %s1609_s19, 64 }
 0x23f   : > { %s829_s15 = scalar_lea.hbm %s1706_s6, %s1721_s29  ;;  %p1195_p13 = scmp.ne.s32.totalorder %s1609_s19, %s1194_s8 }
 0x240   : > { %s1297_s12 = smov [#allocation8]  }
 0x241   : > { %p1196_p4 = pnand %p1195_p13, %p1719_p12  ;;  %s1198_s26 = sshll.u32 %s1297_s12, 4  ;;  %s1199_s26 = int_to_ptr.vmem [resolvable:$false] %s1198_s26 }
 0x242   : > { %s1200_s14 = scalar_lea.vmem %s1199_s26, 128  ;;  %p1201_p7 = scmp.lt.s32.totalorder %s1609_s19, %s1199_s26 }
 0x243   : > { %p1197_p5 = pneg %p1196_p4  ;;  %p1202_p8 = scmp.lt.s32.totalorder %s1200_s14, %s1194_s8 }
 0x245   : > { %p1203_p10 = por %p1202_p8, %p1201_p7 }
 0x247   : > { %p1204_p0 = pnand %p1203_p10, %p1197_p5 }
 0x249   : > { %1207 = shalt.err (!%p1204_p0)
}
 0x24a   : > { %s1208_s17 = scalar_lea.hbm %s829_s15, 64  ;;  %s1212_s16 = scalar_lea.hbm %s1706_s6, 128 }
 0x24b   : > { %p1209_p2 = scmp.ne.s32.totalorder %s829_s15, %s1208_s17  ;;  %p1213_p3 = scmp.lt.s32.totalorder %s829_s15, %s1706_s6 }
 0x24c   : > { %p1214_p6 = scmp.lt.s32.totalorder %s1212_s16, %s1208_s17 }
 0x24d   : > { %p1210_p9 = pnand %p1209_p2, %p1719_p12 }
 0x24e   : > { %p1215_p11 = por %p1214_p6, %p1213_p3 }
 0x24f   : > { %p1211_p1 = pneg %p1210_p9 }
 0x251   : > { %p1216_p13 = pnand %p1215_p11, %p1211_p1 }
 0x253   : > { %1219 = shalt.err (!%p1216_p13)
}
 0x254   : > { %s1722_s8 = smov 16   ;;  %v992_v7 = vld [vmem:[%s1703_s3] ss:$0 sm:$0xff]  ;;  %s1723_s20 = sshll.u32 %s1435_s13, 6 }
 0x255   : > { %1073 = dma.vmem_to_hbm [thread:$0]  (%p1719_p12), %s1609_s19, 64, %s829_s15, %s1581_s18, %s1722_s8, %s1722_s8, %s1296_s7  }
 0x256   : > { %s274_s14 = scalar_lea.vmem [#allocation5], %s1723_s20  ;;  %s1008_s18 = sshll.u32 %s1357_s25, 10 }
 0x257   : > { %s798_s7 = sshll.u32 %s274_s14, 4  ;;  %s1651_s17 = scalar_lea.hbm %s1704_s4, %s1008_s18  ;;  %s1653_s7 = int_to_ptr.vmem [resolvable:$true] %s798_s7 }
 0x258   : > { %s774_s25 = scalar_lea.sflag [#allocation4], %s1435_s13  ;;  %s1220_s11 = scalar_lea.vmem %s1653_s7, 1024 }
 0x259   : > { %p1221_p4 = scmp.ne.s32.totalorder %s1653_s7, %s1220_s11  ;;  %s1298_s29 = smov [#allocation5]  }
 0x25a   : > { %s1224_s16 = sshll.u32 %s1298_s29, 4  ;;  %s1225_s16 = int_to_ptr.vmem [resolvable:$false] %s1224_s16 }
 0x25b   : > { %p1222_p5 = pnand %p1221_p4, %p1719_p12  ;;  %s1226_s28 = scalar_lea.vmem %s1225_s16, 2048 }
 0x25c   : > { %p1227_p8 = scmp.lt.s32.totalorder %s1653_s7, %s1225_s16  ;;  %p1228_p10 = scmp.lt.s32.totalorder %s1226_s28, %s1220_s11 }
 0x25d   : > { %p1223_p7 = pneg %p1222_p5 }
 0x25e   : > { %p1229_p0 = por %p1228_p10, %p1227_p8 }
 0x260   : > { %p1230_p2 = pnand %p1229_p0, %p1223_p7 }
 0x2e4   : > { %v1059_v8 = vpop.f32.mrf.mxu1 }
 0x2e5   : > { %v748_v18 = vadd.f32 %v1059_v8, %v992_v7 }
 0x2e6   : > { %v701_v19 = vpop.f32.mrf.mxu1 }
 0x2e7   : > { %756 = vst.msk [vmem:[%s274_s14 + $0x8] sm:$0xff] %vm303_vm0, %v748_v18  ;;  %v747_v37 = vadd.f32 %v992_v7, %v701_v19 }
 0x2e8   : > { %v1062_v38 = vpop.f32.mrf.mxu1 }
 0x2e9   : > { %755 = vst.msk [vmem:[%s274_s14] sm:$0xff] %vm303_vm0, %v747_v37  ;;  %v750_v39 = vadd.f32 %v1062_v38, %v992_v7 }
 0x2ea   : > { %v711_v40 = vpop.f32.mrf.mxu1 }
 0x2eb   : > { %758 = vst.msk [vmem:[%s274_s14 + $0x18] sm:$0xff] %vm303_vm0, %v750_v39  ;;  %v749_v41 = vadd.f32 %v992_v7, %v711_v40 }
 0x2ec   : > { %v1065_v42 = vpop.f32.mrf.mxu1 }
 0x2ed   : > { %757 = vst.msk [vmem:[%s274_s14 + $0x10] sm:$0xff] %vm303_vm0, %v749_v41  ;;  %v752_v43 = vadd.f32 %v1065_v42, %v992_v7 }
 0x2ee   : > { %v721_v44 = vpop.f32.mrf.mxu1 }
 0x2ef   : > { %760 = vst.msk [vmem:[%s274_s14 + $0x28] sm:$0xff] %vm303_vm0, %v752_v43  ;;  %v751_v45 = vadd.f32 %v992_v7, %v721_v44 }
 0x2f0   : > { %v1068_v48 = vpop.f32.mrf.mxu1 }
 0x2f1   : > { %759 = vst.msk [vmem:[%s274_s14 + $0x20] sm:$0xff] %vm303_vm0, %v751_v45  ;;  %v754_v49 = vadd.f32 %v1068_v48, %v992_v7 }
 0x2f2   : > { %v731_v50 = vpop.f32.mrf.mxu1 }
 0x2f3   : > { %762 = vst.msk [vmem:[%s274_s14 + $0x38] sm:$0xff] %vm303_vm0, %v754_v49  ;;  %v753_v51 = vadd.f32 %v992_v7, %v731_v50 }
 0x2f5   : > { %761 = vst.msk [vmem:[%s274_s14 + $0x30] sm:$0xff] %vm303_vm0, %v753_v51 }
 0x2f6   : > { %1233 = shalt.err (!%p1230_p2)
}
 0x2f7   : > { %s1234_s8 = scalar_lea.hbm %s1651_s17, 1024  ;;  %s1238_s20 = scalar_lea.hbm %s1704_s4, 2048 }
 0x2f8   : > { %p1235_p9 = scmp.ne.s32.totalorder %s1651_s17, %s1234_s8  ;;  %p1239_p6 = scmp.lt.s32.totalorder %s1651_s17, %s1704_s4 }
 0x2f9   : > { %p1240_p11 = scmp.lt.s32.totalorder %s1238_s20, %s1234_s8 }
 0x2fa   : > { %p1236_p1 = pnand %p1235_p9, %p1719_p12 }
 0x2fb   : > { %p1241_p13 = por %p1240_p11, %p1239_p6 }
 0x2fc   : > { %p1237_p3 = pneg %p1236_p1 }
 0x2fe   : > { %p1242_p4 = pnand %p1241_p13, %p1237_p3 }
 0x300   : > { %1245 = shalt.err (!%p1242_p4)
}
 0x301   : > { %s1299_s19 = smov 128   ;;  %s1300_s15 = smov 8  }
 0x302   : > { %1071 = dma.vmem_to_hbm [thread:$0]  (%p1719_p12), %s1653_s7, 1024, %s1651_s17, %s774_s25, %s1299_s19, %s1299_s19, %s1300_s15  }
 0x303 PF: > { %s845_s11 = sand.u32 1, %s1276_s21   ;;  %p1724_p5 = scmp.ne.s32.totalorder %s1716_s10, 0 }
 0x304   : > { %p1725_p7 = scmp.ge.s32.totalorder %s1288_s24, 2  ;;  %s846_s29 = scalar_lea.sflag [#allocation4], %s845_s11 }
 0x306   : > { %p1082_p8 = pnand %p1725_p7, %p1724_p5 }
 0x308   : > { %p1083_p10 = pneg %p1082_p8 }
 0x30a   : > { %1267 = dma.done.wait (%p1083_p10), %s846_s29, 1024  }
 0x30b   : > { %1269 = vsyncadd (%p1083_p10), %s846_s29, 4294966272  ;;  %s1726_s16 = sadd.s32 4294967294, %s1288_s24  }
 0x30c   : > { %s854_s28 = sand.u32 1, %s1726_s16  }
 0x30d   : > { %s855_s8 = scalar_lea.sflag [#allocation7], %s854_s28 }
 0x30e   : > { %1271 = dma.done.wait (%p1083_p10), %s855_s8, 128  }
 0x30f   : > { %1273 = vsyncadd (%p1083_p10), %s855_s8, 4294967168  ;;  %p23_p12 = scmp.ge.s32.totalorder %s1361_s27, 4   ;;  %s1727_s21 = smov %s1280_s22 }
 0x310   : > { %s1728_s22 = smov %s1284_s23  ;;  %s1729_s23 = smov %s1373_s30 }
 0x311   : > { %s1730_s24 = smov %s1361_s27  ;;  %25 = sbr.rel (!%p23_p12) target bundleno = 7 (0x7), region = 113 }
 0x316   :  { %869 = vsyncpa [#allocation3], 1 }
 0x317   :  { %871 = vsyncpa [#allocation3 + $0x1], 1 }
 0x318   :  { %872 = vsyncpa [#allocation4], 1 }
 0x319   :  { %874 = vsyncpa [#allocation4 + $0x1], 1 }
 0x31a   :  { %875 = vsyncpa [#allocation7], 1 }
 0x31b   :  { %877 = vsyncpa [#allocation7 + $0x1], 1 }

</bundles_post_ra>
